<compile_context>
chip_gen: v7x
topology: tpu7x:2x2x1
jax: 0.10.0
libtpu: 0.0.40
codegen_flags: <defaults>
</compile_context>

<pallas_src>
import functools

import jax
import jax.numpy as jnp
from jax.experimental import pallas as pl
from jax.experimental.pallas import tpu as pltpu


def _round_up(x, m):
    return (x + m - 1) // m * m


def _pad_field(field, width):
    """Field plus trailing zero lanes up to `width` (for the packed slab)."""
    pad = width - field.shape[1]
    if pad:
        return [field, jnp.zeros((field.shape[0], pad), field.dtype)]
    return [field]


# ----------------------------------------------------------------------------- kernel
def _cvae_kernel(x_ref, hcr_ref, eps_ref,
                 w1_ref, b1_ref, wmv_ref, bmv_ref,
                 wzd_ref, wzh_ref, bz_ref,
                 wc2_ref, bc2_ref, wd2_ref, bd2_ref,
                 recon_ref, slab_ref,
                 *, dlr_size, hcr_size, n_classes, hcls,
                 off_logvar, off_ypred, off_z, slab_w):
    x = x_ref[...]                         # (tm, d_in) bf16 (cast fused in wrapper)
    hcr = hcr_ref[...]                     # (tm, hcr) f32
    eps = eps_ref[...]                     # (tm, dlr) f32

    # --- Encoder: Linear -> ReLU -> fused {mean|logvar} head (one MXU pass) -----
    h = jnp.dot(x, w1_ref[...], preferred_element_type=jnp.float32) + b1_ref[...]
    h = jnp.maximum(h, 0.0).astype(jnp.bfloat16)
    heads = jnp.dot(h, wmv_ref[...], preferred_element_type=jnp.float32) + bmv_ref[...]
    mean = heads[:, :dlr_size]
    logvar = heads[:, dlr_size:]

    # --- Reparameterization: dlr = mean + exp(0.5*logvar) * eps  (f32 VPU/EUP) --
    std = jnp.exp(0.5 * logvar)
    dlr = mean + std * eps                                           # (tm, dlr) f32

    dlr_bf = dlr.astype(jnp.bfloat16)
    hcr_bf = hcr.astype(jnp.bfloat16)

    # --- Classifier + decoder first layers, fused along N; z = cat([dlr, hcr])
    #     is folded into split weights (no lane concat feeding the MXU) --------
    hz = (jnp.dot(dlr_bf, wzd_ref[...], preferred_element_type=jnp.float32)
          + jnp.dot(hcr_bf, wzh_ref[...], preferred_element_type=jnp.float32)
          + bz_ref[...])
    hz = jnp.maximum(hz, 0.0).astype(jnp.bfloat16)
    hc = hz[:, :hcls]                      # classifier hidden
    hd = hz[:, hcls:]                      # decoder hidden

    y_pred = jnp.dot(hc, wc2_ref[...], preferred_element_type=jnp.float32) + bc2_ref[...]

    logits = jnp.dot(hd, wd2_ref[...], preferred_element_type=jnp.float32) + bd2_ref[...]
    recon_ref[...] = jax.nn.sigmoid(logits).astype(recon_ref.dtype)  # lane-dense

    # --- Pack narrow outputs (mean | logvar | y_pred | z) and store ONCE --------
    pieces = (_pad_field(mean, off_logvar)
              + _pad_field(logvar, off_ypred - off_logvar)
              + _pad_field(y_pred, off_z - off_ypred)
              + [dlr, hcr])
    tail = slab_w - (off_z + dlr_size + hcr_size)
    if tail:
        pieces.append(jnp.zeros((x.shape[0], tail), jnp.float32))
    slab_ref[...] = jnp.concatenate(pieces, axis=1)   # single unmasked store


_WEIGHT_ORDER = ("w1", "b1", "wmv", "bmv", "wzd", "wzh", "bz",
                 "wc2", "bc2", "wd2", "bd2")


# ----------------------------------------------------------------------------- params
def init_params(key, d_in, henc, dlr_size, hcr_size, hcls, n_classes, hdec):
    z_size = dlr_size + hcr_size
    ks = jax.random.split(key, 7)
    s = 0.05
    return {
        "w1": s * jax.random.normal(ks[0], (d_in, henc), jnp.float32),
        "b1": jnp.zeros((1, henc), jnp.float32),
        "wm": s * jax.random.normal(ks[1], (henc, dlr_size), jnp.float32),
        "bm": jnp.zeros((1, dlr_size), jnp.float32),
        "wv": s * jax.random.normal(ks[2], (henc, dlr_size), jnp.float32),
        "bv": jnp.zeros((1, dlr_size), jnp.float32),
        "wc1": s * jax.random.normal(ks[3], (z_size, hcls), jnp.float32),
        "bc1": jnp.zeros((1, hcls), jnp.float32),
        "wc2": s * jax.random.normal(ks[4], (hcls, n_classes), jnp.float32),
        "bc2": jnp.zeros((1, n_classes), jnp.float32),
        "wd1": s * jax.random.normal(ks[5], (z_size, hdec), jnp.float32),
        "bd1": jnp.zeros((1, hdec), jnp.float32),
        "wd2": s * jax.random.normal(ks[6], (hdec, d_in), jnp.float32),
        "bd2": jnp.zeros((1, d_in), jnp.float32),
    }


def prepare_params(params):
    """One-time conversion of the PyTorch-layout params into kernel form.

    * weights -> bf16 (MXU operands), biases -> f32 (added post f32 accumulation)
    * wc1/wd1 are split along the z axis (dlr half vs hcr half) so the kernel
      never materializes z for compute
    * tiny-N matmuls fused: wm|wv -> wmv, (wc1|wd1) per z-half -> wzd/wzh,
      bm|bv -> bmv, bc1|bd1 -> bz
    Call once and reuse; do NOT call per forward step.
    """
    dlr = params["wm"].shape[1]
    bf = lambda a: a.astype(jnp.bfloat16)
    f32 = lambda a: a.astype(jnp.float32)
    wc1, wd1 = params["wc1"], params["wd1"]
    return {
        "w1": bf(params["w1"]), "b1": f32(params["b1"]),
        "wmv": bf(jnp.concatenate([params["wm"], params["wv"]], axis=1)),
        "bmv": f32(jnp.concatenate([params["bm"], params["bv"]], axis=1)),
        "wzd": bf(jnp.concatenate([wc1[:dlr], wd1[:dlr]], axis=1)),
        "wzh": bf(jnp.concatenate([wc1[dlr:], wd1[dlr:]], axis=1)),
        "bz": f32(jnp.concatenate([params["bc1"], params["bd1"]], axis=1)),
        "wc2": bf(params["wc2"]), "bc2": f32(params["bc2"]),
        "wd2": bf(params["wd2"]), "bd2": f32(params["bd2"]),
    }


# ----------------------------------------------------------------------------- tiling
def _choose_batch_tile(batch, batch_tile, min_grid_steps):
    """Pick a batch tile that (a) is a multiple of 16 (bf16 sublane packing),
    (b) divides the lightly padded batch so the wide x stream is never
    jnp.pad-copied up to a full tile, and (c) optionally leaves at least
    `min_grid_steps` grid iterations (pass 2 on v7x so both TCs get work)."""
    b_al = _round_up(max(batch, 1), 16)
    tm = min(_round_up(batch_tile, 16), b_al)
    while b_al % tm:
        tm -= 16
    if min_grid_steps > 1 and b_al >= 16 * min_grid_steps:
        cap = max((b_al // min_grid_steps) // 16 * 16, 16)
        tm = min(tm, cap)
        while b_al % tm:
            tm -= 16
    return tm, b_al


# ----------------------------------------------------------------------------- wrapper
def contrastive_vae_forward(x, y, hcr, eps, kparams, *,
                            batch_tile=1024, min_grid_steps=1,
                            recon_dtype=jnp.bfloat16):
    """Mirror of ContrastiveVAE.forward(x, y, hcr).

    `y` is unused by the reference forward (only y_pred is produced).
    `eps` plays the role of torch.randn((batch, dlr_size)).
    `kparams` must come from prepare_params().
    Pass recon_dtype=jnp.float32 if downstream code needs exact f32 recon
    (bf16 halves the largest HBM writeback of this bandwidth-bound kernel).
    Returns (reconstructed_x, mean, logvar, y_pred, z).
    """
    del y  # not used by the reference forward pass
    B, C, H, W = x.shape
    d_in = C * H * W
    # bf16 cast fused with the reshape -> x is DMA'd at half width
    x_flat = x.reshape(B, d_in).astype(jnp.bfloat16)
    hcr_f = hcr.astype(jnp.float32).squeeze(-1)                      # (B, hcr_size)
    eps_f = eps.astype(jnp.float32)

    dlr_size = kparams["wmv"].shape[1] // 2
    hcr_size = hcr_f.shape[1]
    z_size = dlr_size + hcr_size
    hcls = kparams["wc2"].shape[0]
    n_classes = kparams["wc2"].shape[1]
    assert kparams["wd2"].shape[1] == d_in and eps_f.shape == (B, dlr_size)

    # --- batch tiling: large tiles, divisor of the (<=15-row padded) batch -------
    tm, b_al = _choose_batch_tile(B, batch_tile, min_grid_steps)
    if b_al != B:  # only a sub-16-row pad, never a full-tile pad of x
        pad = ((0, b_al - B), (0, 0))
        x_flat = jnp.pad(x_flat, pad)
        hcr_f = jnp.pad(hcr_f, pad)
        eps_f = jnp.pad(eps_f, pad)
    grid = (b_al // tm,)

    # --- lane-dense packed output slab layout (8-lane aligned fields) -----------
    off_mean = 0
    off_logvar = _round_up(dlr_size, 8)
    off_ypred = off_logvar + _round_up(dlr_size, 8)
    off_z = off_ypred + _round_up(n_classes, 8)
    slab_w = _round_up(off_z + z_size, 128)

    kernel = functools.partial(
        _cvae_kernel,
        dlr_size=dlr_size, hcr_size=hcr_size, n_classes=n_classes, hcls=hcls,
        off_logvar=off_logvar, off_ypred=off_ypred, off_z=off_z, slab_w=slab_w)

    row_spec = lambda w: pl.BlockSpec((tm, w), lambda i: (i, 0))
    # constant index_map -> weights stay resident in VMEM across the batch grid
    rep_spec = lambda a: pl.BlockSpec(a.shape, lambda i: (0, 0))

    weights = tuple(kparams[k] for k in _WEIGHT_ORDER)
    inputs = (x_flat, hcr_f, eps_f) + weights
    in_specs = ([row_spec(d_in), row_spec(hcr_size), row_spec(dlr_size)]
                + [rep_spec(a) for a in weights])

    out_shape = (jax.ShapeDtypeStruct((b_al, d_in), recon_dtype),
                 jax.ShapeDtypeStruct((b_al, slab_w), jnp.float32))
    out_specs = (row_spec(d_in), row_spec(slab_w))

    # scoped-VMEM request: double-buffered streaming tiles + resident weights,
    # clamped to 48 MiB so it stays under v7x's 64 MiB physical VMEM.
    row_bytes = (d_in * 2 + (hcr_size + dlr_size) * 4
                 + d_in * jnp.dtype(recon_dtype).itemsize + slab_w * 4)
    weight_bytes = sum(int(a.size) * a.dtype.itemsize for a in weights)
    vmem_limit = int(min(max(2 * tm * row_bytes + 2 * weight_bytes + (4 << 20),
                             16 << 20), 48 << 20))

    recon_flat, slab = pl.pallas_call(
        kernel,
        grid=grid,
        in_specs=in_specs,
        out_specs=out_specs,
        out_shape=out_shape,
        compiler_params=pltpu.CompilerParams(
            # batch axis is embarrassingly parallel -> megacore sharding on v7x
            dimension_semantics=("parallel",),
            vmem_limit_bytes=vmem_limit),
    )(*inputs)

    reconstructed_x = recon_flat[:B].reshape(B, C, H, W)
    mean = slab[:B, off_mean:off_mean + dlr_size]
    logvar = slab[:B, off_logvar:off_logvar + dlr_size]
    y_pred = slab[:B, off_ypred:off_ypred + n_classes]
    z = slab[:B, off_z:off_z + z_size]
    return reconstructed_x, mean, logvar, y_pred, z


# ----------------------------------------------------------------------------- reference
def _reference_forward(x, hcr, eps, kparams):
    """Pure-JAX reference using the same (bf16-rounded) fused weights."""
    f32 = lambda a: a.astype(jnp.float32)
    B = x.shape[0]
    dlr = kparams["wmv"].shape[1] // 2
    hcls = kparams["wc2"].shape[0]
    xf = x.reshape(B, -1).astype(jnp.bfloat16).astype(jnp.float32)  # bf16 x DMA
    h = jnp.maximum(xf @ f32(kparams["w1"]) + kparams["b1"], 0.0)
    heads = h @ f32(kparams["wmv"]) + kparams["bmv"]
    mean, logvar = heads[:, :dlr], heads[:, dlr:]
    std = jnp.exp(0.5 * logvar)
    dlrf = mean + std * eps.astype(jnp.float32)
    hcr_f = hcr.astype(jnp.float32).squeeze(-1)
    z = jnp.concatenate([dlrf, hcr_f], axis=1)
    hz = jnp.maximum(dlrf @ f32(kparams["wzd"]) + hcr_f @ f32(kparams["wzh"])
                     + kparams["bz"], 0.0)
    hc, hd = hz[:, :hcls], hz[:, hcls:]
    y_pred = hc @ f32(kparams["wc2"]) + kparams["bc2"]
    recon = jax.nn.sigmoid(hd @ f32(kparams["wd2"]) + kparams["bd2"]).reshape(x.shape)
    return recon, mean, logvar, y_pred, z


# ----------------------------------------------------------------------------- main
if __name__ == "__main__":
    # hyperparams: dlr_size=8, hcr_size=8 -> total_latent_size=16
    B, C, H, W = 2, 4, 16, 16
    dlr_size, hcr_size = 8, 8
    henc = hdec = hcls = 32
    n_classes = 2
    d_in = C * H * W

    key = jax.random.PRNGKey(0)
    k_x, k_hcr, k_eps, k_p = jax.random.split(key, 4)

    x = jax.random.normal(k_x, (B, C, H, W), jnp.float32)          # image batch (NCHW)
    y = jnp.zeros((B,), jnp.int32)                                 # labels (unused in fwd)
    hcr = jax.random.normal(k_hcr, (B, hcr_size, 1), jnp.float32)  # hand-crafted repr
    eps = jax.random.normal(k_eps, (B, dlr_size), jnp.float32)     # reparam noise

    params = init_params(k_p, d_in, henc, dlr_size, hcr_size, hcls, n_classes, hdec)
    kparams = prepare_params(params)   # hoisted one-time cast/split/fuse (not per step)

    outs = jax.block_until_ready(contrastive_vae_forward(x, y, hcr, eps, kparams))
    recon, mean, logvar, y_pred, z = outs

    assert recon.shape == (B, C, H, W)
    assert mean.shape == (B, dlr_size) and logvar.shape == (B, dlr_size)
    assert y_pred.shape == (B, n_classes)
    assert z.shape == (B, dlr_size + hcr_size)

    ref = _reference_forward(x, hcr, eps, kparams)
    for name, got, want in zip(("recon", "mean", "logvar", "y_pred", "z"), outs, ref):
        assert got.shape == want.shape, (name, got.shape, want.shape)
        err = float(jnp.max(jnp.abs(got.astype(jnp.float32)
                                    - want.astype(got.dtype).astype(jnp.float32))))
        assert err < 5e-2, (name, err)

    print("KERNEL_OK")
</pallas_src>

<mosaic_0001>
module attributes {stable_mosaic.version = 11 : i64} {
  func.func @_cvae_kernel(%arg0: i32, %arg1: memref<16x1024xbf16, #tpu.memory_space<vmem>>, %arg2: memref<16x8xf32, #tpu.memory_space<vmem>>, %arg3: memref<16x8xf32, #tpu.memory_space<vmem>>, %arg4: memref<1024x32xbf16, #tpu.memory_space<vmem>>, %arg5: memref<1x32xf32, #tpu.memory_space<vmem>>, %arg6: memref<32x16xbf16, #tpu.memory_space<vmem>>, %arg7: memref<1x16xf32, #tpu.memory_space<vmem>>, %arg8: memref<8x64xbf16, #tpu.memory_space<vmem>>, %arg9: memref<8x64xbf16, #tpu.memory_space<vmem>>, %arg10: memref<1x64xf32, #tpu.memory_space<vmem>>, %arg11: memref<32x2xbf16, #tpu.memory_space<vmem>>, %arg12: memref<1x2xf32, #tpu.memory_space<vmem>>, %arg13: memref<32x1024xbf16, #tpu.memory_space<vmem>>, %arg14: memref<1x1024xf32, #tpu.memory_space<vmem>>, %arg15: memref<16x1024xbf16, #tpu.memory_space<vmem>>, %arg16: memref<16x128xf32, #tpu.memory_space<vmem>>) attributes {dimension_semantics = [#tpu.dimension_semantics<parallel>], iteration_bounds = array<i64: 1>, scalar_prefetch = 0 : i64, scratch_operands = 0 : i64, tpu.core_type = #tpu.core_type<tc>, window_params = [{transform_indices = @transform_0, window_bounds = array<i64: 16, 1024>}, {transform_indices = @transform_1, window_bounds = array<i64: 16, 8>}, {transform_indices = @transform_2, window_bounds = array<i64: 16, 8>}, {pipeline_mode = #tpu.pipeline_mode<synchronous>, transform_indices = @transform_3, window_bounds = array<i64: 1024, 32>}, {pipeline_mode = #tpu.pipeline_mode<synchronous>, transform_indices = @transform_4, window_bounds = array<i64: 1, 32>}, {pipeline_mode = #tpu.pipeline_mode<synchronous>, transform_indices = @transform_5, window_bounds = array<i64: 32, 16>}, {pipeline_mode = #tpu.pipeline_mode<synchronous>, transform_indices = @transform_6, window_bounds = array<i64: 1, 16>}, {pipeline_mode = #tpu.pipeline_mode<synchronous>, transform_indices = @transform_7, window_bounds = array<i64: 8, 64>}, {pipeline_mode = #tpu.pipeline_mode<synchronous>, transform_indices = @transform_8, window_bounds = array<i64: 8, 64>}, {pipeline_mode = #tpu.pipeline_mode<synchronous>, transform_indices = @transform_9, window_bounds = array<i64: 1, 64>}, {pipeline_mode = #tpu.pipeline_mode<synchronous>, transform_indices = @transform_10, window_bounds = array<i64: 32, 2>}, {pipeline_mode = #tpu.pipeline_mode<synchronous>, transform_indices = @transform_11, window_bounds = array<i64: 1, 2>}, {pipeline_mode = #tpu.pipeline_mode<synchronous>, transform_indices = @transform_12, window_bounds = array<i64: 32, 1024>}, {pipeline_mode = #tpu.pipeline_mode<synchronous>, transform_indices = @transform_13, window_bounds = array<i64: 1, 1024>}, {transform_indices = @transform_14, window_bounds = array<i64: 16, 1024>}, {transform_indices = @transform_15, window_bounds = array<i64: 16, 128>}]} {
    %c0 = arith.constant 0 : index
    %c0_0 = arith.constant 0 : index
    %0 = vector.load %arg1[%c0, %c0_0] : memref<16x1024xbf16, #tpu.memory_space<vmem>>, vector<16x1024xbf16>
    %c0_1 = arith.constant 0 : index
    %c0_2 = arith.constant 0 : index
    %1 = vector.load %arg2[%c0_1, %c0_2] : memref<16x8xf32, #tpu.memory_space<vmem>>, vector<16x8xf32>
    %c0_3 = arith.constant 0 : index
    %c0_4 = arith.constant 0 : index
    %2 = vector.load %arg3[%c0_3, %c0_4] : memref<16x8xf32, #tpu.memory_space<vmem>>, vector<16x8xf32>
    %c0_5 = arith.constant 0 : index
    %c0_6 = arith.constant 0 : index
    %3 = vector.load %arg4[%c0_5, %c0_6] : memref<1024x32xbf16, #tpu.memory_space<vmem>>, vector<1024x32xbf16>
    %cst = arith.constant dense<0.000000e+00> : vector<16x32xf32>
    %4 = tpu.matmul %0, %3, %cst {dimension_numbers = #tpu.dot_dimension_numbers<[1], [0], [0], [1], [0, 0, 1, 1], [], []>} : vector<16x1024xbf16>, vector<1024x32xbf16>, vector<16x32xf32> -> vector<16x32xf32>
    %c0_7 = arith.constant 0 : index
    %c0_8 = arith.constant 0 : index
    %5 = vector.load %arg5[%c0_7, %c0_8] : memref<1x32xf32, #tpu.memory_space<vmem>>, vector<1x32xf32>
    %6 = vector.broadcast %5 : vector<1x32xf32> to vector<16x32xf32>
    %7 = arith.addf %4, %6 : vector<16x32xf32>
    %cst_9 = arith.constant 0.000000e+00 : f32
    %8 = vector.broadcast %cst_9 : f32 to vector<16x32xf32>
    %9 = arith.maximumf %7, %8 : vector<16x32xf32>
    %10 = arith.truncf %9 : vector<16x32xf32> to vector<16x32xbf16>
    %c0_10 = arith.constant 0 : index
    %c0_11 = arith.constant 0 : index
    %11 = vector.load %arg6[%c0_10, %c0_11] : memref<32x16xbf16, #tpu.memory_space<vmem>>, vector<32x16xbf16>
    %cst_12 = arith.constant dense<0.000000e+00> : vector<16x16xf32>
    %12 = tpu.matmul %10, %11, %cst_12 {dimension_numbers = #tpu.dot_dimension_numbers<[1], [0], [0], [1], [0, 0, 1, 1], [], []>} : vector<16x32xbf16>, vector<32x16xbf16>, vector<16x16xf32> -> vector<16x16xf32>
    %c0_13 = arith.constant 0 : index
    %c0_14 = arith.constant 0 : index
    %13 = vector.load %arg7[%c0_13, %c0_14] : memref<1x16xf32, #tpu.memory_space<vmem>>, vector<1x16xf32>
    %14 = vector.broadcast %13 : vector<1x16xf32> to vector<16x16xf32>
    %15 = arith.addf %12, %14 : vector<16x16xf32>
    %16 = vector.extract_strided_slice %15 {offsets = [0, 0], sizes = [16, 8], strides = [1, 1]} : vector<16x16xf32> to vector<16x8xf32>
    %17 = vector.extract_strided_slice %15 {offsets = [0, 8], sizes = [16, 8], strides = [1, 1]} : vector<16x16xf32> to vector<16x8xf32>
    %cst_15 = arith.constant 5.000000e-01 : f32
    %18 = vector.broadcast %cst_15 : f32 to vector<16x8xf32>
    %19 = arith.mulf %18, %17 : vector<16x8xf32>
    %20 = math.exp %19 : vector<16x8xf32>
    %21 = arith.mulf %20, %2 : vector<16x8xf32>
    %22 = arith.addf %16, %21 : vector<16x8xf32>
    %23 = arith.truncf %22 : vector<16x8xf32> to vector<16x8xbf16>
    %24 = arith.truncf %1 : vector<16x8xf32> to vector<16x8xbf16>
    %c0_16 = arith.constant 0 : index
    %c0_17 = arith.constant 0 : index
    %25 = vector.load %arg8[%c0_16, %c0_17] : memref<8x64xbf16, #tpu.memory_space<vmem>>, vector<8x64xbf16>
    %cst_18 = arith.constant dense<0.000000e+00> : vector<16x64xf32>
    %26 = tpu.matmul %23, %25, %cst_18 {dimension_numbers = #tpu.dot_dimension_numbers<[1], [0], [0], [1], [0, 0, 1, 1], [], []>} : vector<16x8xbf16>, vector<8x64xbf16>, vector<16x64xf32> -> vector<16x64xf32>
    %c0_19 = arith.constant 0 : index
    %c0_20 = arith.constant 0 : index
    %27 = vector.load %arg9[%c0_19, %c0_20] : memref<8x64xbf16, #tpu.memory_space<vmem>>, vector<8x64xbf16>
    %cst_21 = arith.constant dense<0.000000e+00> : vector<16x64xf32>
    %28 = tpu.matmul %24, %27, %cst_21 {dimension_numbers = #tpu.dot_dimension_numbers<[1], [0], [0], [1], [0, 0, 1, 1], [], []>} : vector<16x8xbf16>, vector<8x64xbf16>, vector<16x64xf32> -> vector<16x64xf32>
    %29 = arith.addf %26, %28 : vector<16x64xf32>
    %c0_22 = arith.constant 0 : index
    %c0_23 = arith.constant 0 : index
    %30 = vector.load %arg10[%c0_22, %c0_23] : memref<1x64xf32, #tpu.memory_space<vmem>>, vector<1x64xf32>
    %31 = vector.broadcast %30 : vector<1x64xf32> to vector<16x64xf32>
    %32 = arith.addf %29, %31 : vector<16x64xf32>
    %cst_24 = arith.constant 0.000000e+00 : f32
    %33 = vector.broadcast %cst_24 : f32 to vector<16x64xf32>
    %34 = arith.maximumf %32, %33 : vector<16x64xf32>
    %35 = arith.truncf %34 : vector<16x64xf32> to vector<16x64xbf16>
    %36 = vector.extract_strided_slice %35 {offsets = [0, 0], sizes = [16, 32], strides = [1, 1]} : vector<16x64xbf16> to vector<16x32xbf16>
    %37 = vector.extract_strided_slice %35 {offsets = [0, 32], sizes = [16, 32], strides = [1, 1]} : vector<16x64xbf16> to vector<16x32xbf16>
    %c0_25 = arith.constant 0 : index
    %c0_26 = arith.constant 0 : index
    %38 = vector.load %arg11[%c0_25, %c0_26] : memref<32x2xbf16, #tpu.memory_space<vmem>>, vector<32x2xbf16>
    %cst_27 = arith.constant dense<0.000000e+00> : vector<16x2xf32>
    %39 = tpu.matmul %36, %38, %cst_27 {dimension_numbers = #tpu.dot_dimension_numbers<[1], [0], [0], [1], [0, 0, 1, 1], [], []>} : vector<16x32xbf16>, vector<32x2xbf16>, vector<16x2xf32> -> vector<16x2xf32>
    %c0_28 = arith.constant 0 : index
    %c0_29 = arith.constant 0 : index
    %40 = vector.load %arg12[%c0_28, %c0_29] : memref<1x2xf32, #tpu.memory_space<vmem>>, vector<1x2xf32>
    %41 = vector.broadcast %40 : vector<1x2xf32> to vector<16x2xf32>
    %42 = arith.addf %39, %41 : vector<16x2xf32>
    %c0_30 = arith.constant 0 : index
    %c0_31 = arith.constant 0 : index
    %43 = vector.load %arg13[%c0_30, %c0_31] : memref<32x1024xbf16, #tpu.memory_space<vmem>>, vector<32x1024xbf16>
    %cst_32 = arith.constant dense<0.000000e+00> : vector<16x1024xf32>
    %44 = tpu.matmul %37, %43, %cst_32 {dimension_numbers = #tpu.dot_dimension_numbers<[1], [0], [0], [1], [0, 0, 1, 1], [], []>} : vector<16x32xbf16>, vector<32x1024xbf16>, vector<16x1024xf32> -> vector<16x1024xf32>
    %c0_33 = arith.constant 0 : index
    %c0_34 = arith.constant 0 : index
    %45 = vector.load %arg14[%c0_33, %c0_34] : memref<1x1024xf32, #tpu.memory_space<vmem>>, vector<1x1024xf32>
    %46 = vector.broadcast %45 : vector<1x1024xf32> to vector<16x1024xf32>
    %47 = arith.addf %44, %46 : vector<16x1024xf32>
    %48 = arith.negf %47 : vector<16x1024xf32>
    %49 = math.exp %48 : vector<16x1024xf32>
    %cst_35 = arith.constant 1.000000e+00 : f32
    %50 = vector.broadcast %cst_35 : f32 to vector<16x1024xf32>
    %51 = arith.addf %50, %49 : vector<16x1024xf32>
    %52 = arith.divf %50, %51 : vector<16x1024xf32>
    %53 = arith.truncf %52 : vector<16x1024xf32> to vector<16x1024xbf16>
    %c0_36 = arith.constant 0 : index
    %c0_37 = arith.constant 0 : index
    %54 = vector.load %arg15[%c0_36, %c0_37] : memref<16x1024xbf16, #tpu.memory_space<vmem>>, vector<16x1024xbf16>
    tpu.vector_store %arg15[%c0_36, %c0_37], %53 {strides = array<i32>} : memref<16x1024xbf16, #tpu.memory_space<vmem>>, vector<16x1024xbf16>,
    %cst_38 = arith.constant 0.000000e+00 : f32
    %55 = vector.broadcast %cst_38 : f32 to vector<16x6xf32>
    %cst_39 = arith.constant 0.000000e+00 : f32
    %56 = vector.broadcast %cst_39 : f32 to vector<16x88xf32>
    %57 = tpu.concatenate %16, %17, %42, %55, %22, %1, %56 in 1 : vector<16x8xf32>, vector<16x8xf32>, vector<16x2xf32>, vector<16x6xf32>, vector<16x8xf32>, vector<16x8xf32>, vector<16x88xf32> -> vector<16x128xf32>
    %c0_40 = arith.constant 0 : index
    %c0_41 = arith.constant 0 : index
    %58 = vector.load %arg16[%c0_40, %c0_41] : memref<16x128xf32, #tpu.memory_space<vmem>>, vector<16x128xf32>
    tpu.vector_store %arg16[%c0_40, %c0_41], %57 {strides = array<i32>} : memref<16x128xf32, #tpu.memory_space<vmem>>, vector<16x128xf32>,
    return
  }
  func.func @transform_0(%arg0: i32) -> (i32, i32) {
    %c0_i32 = arith.constant 0 : i32
    %c0_i32_0 = arith.constant 0 : i32
    return %arg0, %c0_i32 : i32, i32
  }
  func.func @transform_1(%arg0: i32) -> (i32, i32) {
    %c0_i32 = arith.constant 0 : i32
    %c0_i32_0 = arith.constant 0 : i32
    return %arg0, %c0_i32 : i32, i32
  }
  func.func @transform_2(%arg0: i32) -> (i32, i32) {
    %c0_i32 = arith.constant 0 : i32
    %c0_i32_0 = arith.constant 0 : i32
    return %arg0, %c0_i32 : i32, i32
  }
  func.func @transform_3(%arg0: i32) -> (i32, i32) {
    %c0_i32 = arith.constant 0 : i32
    %c0_i32_0 = arith.constant 0 : i32
    %c0_i32_1 = arith.constant 0 : i32
    return %c0_i32, %c0_i32_0 : i32, i32
  }
  func.func @transform_4(%arg0: i32) -> (i32, i32) {
    %c0_i32 = arith.constant 0 : i32
    %c0_i32_0 = arith.constant 0 : i32
    %c0_i32_1 = arith.constant 0 : i32
    return %c0_i32, %c0_i32_0 : i32, i32
  }
  func.func @transform_5(%arg0: i32) -> (i32, i32) {
    %c0_i32 = arith.constant 0 : i32
    %c0_i32_0 = arith.constant 0 : i32
    %c0_i32_1 = arith.constant 0 : i32
    return %c0_i32, %c0_i32_0 : i32, i32
  }
  func.func @transform_6(%arg0: i32) -> (i32, i32) {
    %c0_i32 = arith.constant 0 : i32
    %c0_i32_0 = arith.constant 0 : i32
    %c0_i32_1 = arith.constant 0 : i32
    return %c0_i32, %c0_i32_0 : i32, i32
  }
  func.func @transform_7(%arg0: i32) -> (i32, i32) {
    %c0_i32 = arith.constant 0 : i32
    %c0_i32_0 = arith.constant 0 : i32
    %c0_i32_1 = arith.constant 0 : i32
    return %c0_i32, %c0_i32_0 : i32, i32
  }
  func.func @transform_8(%arg0: i32) -> (i32, i32) {
    %c0_i32 = arith.constant 0 : i32
    %c0_i32_0 = arith.constant 0 : i32
    %c0_i32_1 = arith.constant 0 : i32
    return %c0_i32, %c0_i32_0 : i32, i32
  }
  func.func @transform_9(%arg0: i32) -> (i32, i32) {
    %c0_i32 = arith.constant 0 : i32
    %c0_i32_0 = arith.constant 0 : i32
    %c0_i32_1 = arith.constant 0 : i32
    return %c0_i32, %c0_i32_0 : i32, i32
  }
  func.func @transform_10(%arg0: i32) -> (i32, i32) {
    %c0_i32 = arith.constant 0 : i32
    %c0_i32_0 = arith.constant 0 : i32
    %c0_i32_1 = arith.constant 0 : i32
    return %c0_i32, %c0_i32_0 : i32, i32
  }
  func.func @transform_11(%arg0: i32) -> (i32, i32) {
    %c0_i32 = arith.constant 0 : i32
    %c0_i32_0 = arith.constant 0 : i32
    %c0_i32_1 = arith.constant 0 : i32
    return %c0_i32, %c0_i32_0 : i32, i32
  }
  func.func @transform_12(%arg0: i32) -> (i32, i32) {
    %c0_i32 = arith.constant 0 : i32
    %c0_i32_0 = arith.constant 0 : i32
    %c0_i32_1 = arith.constant 0 : i32
    return %c0_i32, %c0_i32_0 : i32, i32
  }
  func.func @transform_13(%arg0: i32) -> (i32, i32) {
    %c0_i32 = arith.constant 0 : i32
    %c0_i32_0 = arith.constant 0 : i32
    %c0_i32_1 = arith.constant 0 : i32
    return %c0_i32, %c0_i32_0 : i32, i32
  }
  func.func @transform_14(%arg0: i32) -> (i32, i32) {
    %c0_i32 = arith.constant 0 : i32
    %c0_i32_0 = arith.constant 0 : i32
    return %arg0, %c0_i32 : i32, i32
  }
  func.func @transform_15(%arg0: i32) -> (i32, i32) {
    %c0_i32 = arith.constant 0 : i32
    %c0_i32_0 = arith.constant 0 : i32
    return %arg0, %c0_i32 : i32, i32
  }
}

</mosaic_0001>

<bundles_post_ra>
// kernel: tpu_custom_call.1
= control target key start
LH: loop header
LB: loop body
LE: loop exit
PB: predicated region body
PF: predicated region fallthrough
CT: control target
= control target key end

     0   :  { %21 = vsyncpa [#allocation3], 0  ;;  %s2565_s0 = inlined_call_operand.vmem [shape: bf16[16,1024], index: 0, kind: input, shape index: {}]   ;;  %s2566_s1 = inlined_call_operand.vmem [shape: f32[16,8], index: 1, kind: input, shape index: {}]   ;;  %s2567_s2 = inlined_call_operand.vmem [shape: f32[16,8], index: 2, kind: input, shape index: {}]   ;;  %s2568_s3 = inlined_call_operand.vmem [shape: bf16[1024,32], index: 3, kind: input, shape index: {}]   ;;  %s2569_s4 = inlined_call_operand.vmem [shape: f32[1,32], index: 4, kind: input, shape index: {}]   ;;  %s2570_s5 = inlined_call_operand.vmem [shape: bf16[32,16], index: 5, kind: input, shape index: {}]   ;;  %s2571_s6 = inlined_call_operand.vmem [shape: f32[1,16], index: 6, kind: input, shape index: {}]   ;;  %s2572_s7 = inlined_call_operand.vmem [shape: bf16[8,64], index: 7, kind: input, shape index: {}]   ;;  %s2573_s8 = inlined_call_operand.vmem [shape: bf16[8,64], index: 8, kind: input, shape index: {}]   ;;  %s2574_s9 = inlined_call_operand.vmem [shape: f32[1,64], index: 9, kind: input, shape index: {}]   ;;  %s2575_s10 = inlined_call_operand.vmem [shape: bf16[32,2], index: 10, kind: input, shape index: {}]   ;;  %s2576_s11 = inlined_call_operand.vmem [shape: f32[1,2], index: 11, kind: input, shape index: {}]   ;;  %s2577_s12 = inlined_call_operand.vmem [shape: bf16[32,1024], index: 12, kind: input, shape index: {}]   ;;  %s2578_s13 = inlined_call_operand.vmem [shape: f32[1,1024], index: 13, kind: input, shape index: {}]   ;;  %s2579_s14 = inlined_call_operand.hbm [shape: bf16[16,1024], index: 14, kind: output, shape index: {0}]   ;;  %s2580_s15 = inlined_call_operand.hbm [shape: f32[16,128], index: 15, kind: output, shape index: {1}]  }
   0x1   :  { %v1878_v0 = vld [vmem:[%s2568_s3 + $0x40] sm:$0xff]   ;;  %v1882_v4 = vld [vmem:[%s2568_s3 + $0x48] sm:$0xff]   ;;  %v1886_v8 = vld [vmem:[%s2568_s3 + $0x50] sm:$0xff]  }
   0x2   :  { %v1879_v1 = vld [vmem:[%s2568_s3 + $0xc0] sm:$0xff]   ;;  %1739 = vmatprep.subr.bf16.mxu0 %v1878_v0  ;;  %v1883_v5 = vld [vmem:[%s2568_s3 + $0xc8] sm:$0xff]   ;;  %v1887_v9 = vld [vmem:[%s2568_s3 + $0xd0] sm:$0xff]  }
   0x3   :  { %v1880_v2 = vld [vmem:[%s2568_s3] sm:$0xff]   ;;  %1761 = vmatprep.subr.bf16.mxu1 %v1879_v1  ;;  %v1884_v6 = vld [vmem:[%s2568_s3 + $0x8] sm:$0xff]   ;;  %v1888_v10 = vld [vmem:[%s2568_s3 + $0x10] sm:$0xff]  }
   0x4   :  { %v1881_v3 = vld [vmem:[%s2568_s3 + $0x80] sm:$0xff]   ;;  %1740 = vmatpush3.bf16.msra.mxu0 %v1880_v2  ;;  %v1885_v7 = vld [vmem:[%s2568_s3 + $0x88] sm:$0xff]   ;;  %v1889_v11 = vld [vmem:[%s2568_s3 + $0x90] sm:$0xff]  }
   0x5   :  { %1762 = vmatpush3.bf16.msra.mxu1 %v1881_v3  ;;  %1741 = vmatprep.subr.bf16.mxu0 %v1882_v4  ;;  %v1890_v12 = vld [vmem:[%s2568_s3 + $0x58] sm:$0xff]   ;;  %v1894_v16 = vld [vmem:[%s2568_s3 + $0x60] sm:$0xff]   ;;  %v1898_v20 = vld [vmem:[%s2568_s3 + $0x68] sm:$0xff]  }
   0x6   :  { %1763 = vmatprep.subr.bf16.mxu1 %v1883_v5  ;;  %v1891_v13 = vld [vmem:[%s2568_s3 + $0xd8] sm:$0xff]   ;;  %v1895_v17 = vld [vmem:[%s2568_s3 + $0xe0] sm:$0xff]   ;;  %v1899_v21 = vld [vmem:[%s2568_s3 + $0xe8] sm:$0xff]  }
   0x7   :  { %v1892_v14 = vld [vmem:[%s2568_s3 + $0x18] sm:$0xff]   ;;  %v1896_v18 = vld [vmem:[%s2568_s3 + $0x20] sm:$0xff]   ;;  %v1900_v22 = vld [vmem:[%s2568_s3 + $0x28] sm:$0xff]  }
   0x8   :  { %1742 = vmatpush3.bf16.msra.mxu0 %v1884_v6  ;;  %v1893_v15 = vld [vmem:[%s2568_s3 + $0x98] sm:$0xff]   ;;  %v1897_v19 = vld [vmem:[%s2568_s3 + $0xa0] sm:$0xff]   ;;  %v1901_v23 = vld [vmem:[%s2568_s3 + $0xa8] sm:$0xff]  }
   0x9   :  { %1764 = vmatpush3.bf16.msra.mxu1 %v1885_v7  ;;  %1743 = vmatprep.subr.bf16.mxu0 %v1886_v8  ;;  %v1902_v24 = vld [vmem:[%s2568_s3 + $0x70] sm:$0xff]   ;;  %v1906_v28 = vld [vmem:[%s2568_s3 + $0x78] sm:$0xff]   ;;  %v52_v32 = vld [vmem:[%s2565_s0] sm:$0xff] }
   0xa   :  { %1765 = vmatprep.subr.bf16.mxu1 %v1887_v9  ;;  %v1903_v25 = vld [vmem:[%s2568_s3 + $0xf0] sm:$0xff]   ;;  %v1907_v29 = vld [vmem:[%s2568_s3 + $0xf8] sm:$0xff]   ;;  %v56_v33 = vld [vmem:[%s2565_s0 + $0x20] sm:$0xff] }
   0xb   :  { %v1904_v26 = vld [vmem:[%s2568_s3 + $0x30] sm:$0xff]   ;;  %v1908_v30 = vld [vmem:[%s2568_s3 + $0x38] sm:$0xff]   ;;  %v53_v34 = vld [vmem:[%s2565_s0 + $0x8] sm:$0xff]  ;;  %v1604_v35 = vcombine.low %v52_v32, %v56_v33  ;;  %v1605_v36 = vcombine.high %v52_v32, %v56_v33 }
   0xc   :  { %1744 = vmatpush3.bf16.msra.mxu0 %v1888_v10  ;;  %v1905_v27 = vld [vmem:[%s2568_s3 + $0xb0] sm:$0xff]   ;;  %v1909_v31 = vld [vmem:[%s2568_s3 + $0xb8] sm:$0xff]   ;;  %v57_v37 = vld [vmem:[%s2565_s0 + $0x28] sm:$0xff] }
   0xd   :  { %1766 = vmatpush3.bf16.msra.mxu1 %v1889_v11  ;;  %1745 = vmatprep.subr.bf16.mxu0 %v1890_v12  ;;  %v1606_v38 = vcombine.low %v53_v34, %v57_v37  ;;  %v1607_v39 = vcombine.high %v53_v34, %v57_v37  ;;  %v1910_v40 = vld [vmem:[%s2568_s3 + $0x140] sm:$0xff]   ;;  %v1914_v44 = vld [vmem:[%s2568_s3 + $0x148] sm:$0xff]   ;;  %v1918_v48 = vld [vmem:[%s2568_s3 + $0x150] sm:$0xff]  }
   0xe   :  { %1767 = vmatprep.subr.bf16.mxu1 %v1891_v13  ;;  %655 = vmatprep.mubr.bf16.mxu0 %v1605_v36  ;;  %v1911_v41 = vld [vmem:[%s2568_s3 + $0x1c0] sm:$0xff]   ;;  %v1915_v45 = vld [vmem:[%s2568_s3 + $0x1c8] sm:$0xff]   ;;  %v1919_v49 = vld [vmem:[%s2568_s3 + $0x1d0] sm:$0xff]  }
   0xf   :  { %696 = vmatprep.mubr.bf16.mxu1 %v1607_v39  ;;  %v1912_v42 = vld [vmem:[%s2568_s3 + $0x100] sm:$0xff]   ;;  %v1916_v46 = vld [vmem:[%s2568_s3 + $0x108] sm:$0xff]   ;;  %v1920_v50 = vld [vmem:[%s2568_s3 + $0x110] sm:$0xff]  }
  0x10   :  { %1746 = vmatpush3.bf16.msra.mxu0 %v1892_v14  ;;  %v1913_v43 = vld [vmem:[%s2568_s3 + $0x180] sm:$0xff]   ;;  %v1917_v47 = vld [vmem:[%s2568_s3 + $0x188] sm:$0xff]   ;;  %v1921_v51 = vld [vmem:[%s2568_s3 + $0x190] sm:$0xff]  }
  0x11   :  { %1768 = vmatpush3.bf16.msra.mxu1 %v1893_v15  ;;  %1747 = vmatprep.subr.bf16.mxu0 %v1894_v16  ;;  %v1922_v52 = vld [vmem:[%s2568_s3 + $0x158] sm:$0xff]   ;;  %v1926_v56 = vld [vmem:[%s2568_s3 + $0x160] sm:$0xff]   ;;  %v1930_v60 = vld [vmem:[%s2568_s3 + $0x168] sm:$0xff]  }
  0x12   :  { %1769 = vmatprep.subr.bf16.mxu1 %v1895_v17  ;;  %v1923_v53 = vld [vmem:[%s2568_s3 + $0x1d8] sm:$0xff]   ;;  %v1927_v57 = vld [vmem:[%s2568_s3 + $0x1e0] sm:$0xff]   ;;  %v1931_v61 = vld [vmem:[%s2568_s3 + $0x1e8] sm:$0xff]  }
  0x13   :  { %v1924_v54 = vld [vmem:[%s2568_s3 + $0x118] sm:$0xff]   ;;  %v1928_v58 = vld [vmem:[%s2568_s3 + $0x120] sm:$0xff]   ;;  %v1932_v62 = vld [vmem:[%s2568_s3 + $0x128] sm:$0xff]  }
  0x14   :  { %1748 = vmatpush3.bf16.msra.mxu0 %v1896_v18  ;;  %v1925_v55 = vld [vmem:[%s2568_s3 + $0x198] sm:$0xff]   ;;  %v1929_v59 = vld [vmem:[%s2568_s3 + $0x1a0] sm:$0xff]   ;;  %v1933_v63 = vld [vmem:[%s2568_s3 + $0x1a8] sm:$0xff]  }
  0x15   :  { %1770 = vmatpush3.bf16.msra.mxu1 %v1897_v19  ;;  %1749 = vmatprep.subr.bf16.mxu0 %v1898_v20  ;;  %v1934_v0 = vld [vmem:[%s2568_s3 + $0x170] sm:$0xff]   ;;  %v1938_v4 = vld [vmem:[%s2568_s3 + $0x178] sm:$0xff]  }
  0x16   :  { %1771 = vmatprep.subr.bf16.mxu1 %v1899_v21  ;;  %v1935_v1 = vld [vmem:[%s2568_s3 + $0x1f0] sm:$0xff]   ;;  %v1939_v5 = vld [vmem:[%s2568_s3 + $0x1f8] sm:$0xff]  }
  0x17   :  { %v1936_v2 = vld [vmem:[%s2568_s3 + $0x130] sm:$0xff]   ;;  %v1940_v6 = vld [vmem:[%s2568_s3 + $0x138] sm:$0xff]  }
  0x18   :  { %1750 = vmatpush3.bf16.msra.mxu0 %v1900_v22  ;;  %v1937_v3 = vld [vmem:[%s2568_s3 + $0x1b0] sm:$0xff]   ;;  %v1941_v7 = vld [vmem:[%s2568_s3 + $0x1b8] sm:$0xff]  }
  0x19   :  { %1772 = vmatpush3.bf16.msra.mxu1 %v1901_v23  ;;  %1751 = vmatprep.subr.bf16.mxu0 %v1902_v24  ;;  %v54_v8 = vld [vmem:[%s2565_s0 + $0x10] sm:$0xff]  ;;  %v55_v12 = vld [vmem:[%s2565_s0 + $0x18] sm:$0xff] }
  0x1a   :  { %1773 = vmatprep.subr.bf16.mxu1 %v1903_v25  ;;  %v58_v9 = vld [vmem:[%s2565_s0 + $0x30] sm:$0xff]  ;;  %v59_v13 = vld [vmem:[%s2565_s0 + $0x38] sm:$0xff] }
  0x1b   :  { %v1608_v10 = vcombine.low %v54_v8, %v58_v9  ;;  %v1609_v11 = vcombine.high %v54_v8, %v58_v9  ;;  %v1610_v14 = vcombine.low %v55_v12, %v59_v13  ;;  %v1611_v15 = vcombine.high %v55_v12, %v59_v13 }
  0x1c   :  { %1752 = vmatpush3.bf16.msra.mxu0 %v1904_v26 }
  0x1d   :  { %1774 = vmatpush3.bf16.msra.mxu1 %v1905_v27  ;;  %1753 = vmatprep.subr.bf16.mxu0 %v1906_v28 }
  0x1e   :  { %1775 = vmatprep.subr.bf16.mxu1 %v1907_v29 }
  0x20   :  { %1754 = vmatpush3.bf16.msra.mxu0 %v1908_v30 }
  0x21   :  { %1776 = vmatpush3.bf16.msra.mxu1 %v1909_v31  ;;  %1783 = vmatprep.subr.bf16.mxu0 %v1910_v40 }
  0x22   :  { %1805 = vmatprep.subr.bf16.mxu1 %v1911_v41 }
  0x23   :  { %656 = vmatmul.mubr.bf16.vlgmr.msra.gmra.mrb[0].mxu0 %v1604_v35 }
  0x24   :  { %697 = vmatmul.mubr.bf16.vlgmr.msra.gmra.mrb[0].mxu1 %v1606_v38  ;;  %1784 = vmatpush3.bf16.msra.mxu0 %v1912_v42 }
  0x25   :  { %1806 = vmatpush3.bf16.msra.mxu1 %v1913_v43  ;;  %1785 = vmatprep.subr.bf16.mxu0 %v1914_v44 }
  0x26   :  { %1807 = vmatprep.subr.bf16.mxu1 %v1915_v45  ;;  %737 = vmatprep.mubr.bf16.mxu0 %v1609_v11 }
  0x27   :  { %778 = vmatprep.mubr.bf16.mxu1 %v1611_v15 }
  0x28   :  { %1786 = vmatpush3.bf16.msra.mxu0 %v1916_v46 }
  0x29   :  { %1808 = vmatpush3.bf16.msra.mxu1 %v1917_v47  ;;  %1787 = vmatprep.subr.bf16.mxu0 %v1918_v48 }
  0x2a   :  { %1809 = vmatprep.subr.bf16.mxu1 %v1919_v49 }
  0x2c   :  { %1788 = vmatpush3.bf16.msra.mxu0 %v1920_v50 }
  0x2d   :  { %1810 = vmatpush3.bf16.msra.mxu1 %v1921_v51  ;;  %1789 = vmatprep.subr.bf16.mxu0 %v1922_v52 }
  0x2e   :  { %1811 = vmatprep.subr.bf16.mxu1 %v1923_v53 }
  0x30   :  { %1790 = vmatpush3.bf16.msra.mxu0 %v1924_v54 }
  0x31   :  { %1812 = vmatpush3.bf16.msra.mxu1 %v1925_v55  ;;  %1791 = vmatprep.subr.bf16.mxu0 %v1926_v56 }
  0x32   :  { %1813 = vmatprep.subr.bf16.mxu1 %v1927_v57 }
  0x34   :  { %1792 = vmatpush3.bf16.msra.mxu0 %v1928_v58 }
  0x35   :  { %1814 = vmatpush3.bf16.msra.mxu1 %v1929_v59  ;;  %1793 = vmatprep.subr.bf16.mxu0 %v1930_v60 }
  0x36   :  { %1815 = vmatprep.subr.bf16.mxu1 %v1931_v61 }
  0x38   :  { %1794 = vmatpush3.bf16.msra.mxu0 %v1932_v62 }
  0x39   :  { %1816 = vmatpush3.bf16.msra.mxu1 %v1933_v63  ;;  %1795 = vmatprep.subr.bf16.mxu0 %v1934_v0 }
  0x3a   :  { %1817 = vmatprep.subr.bf16.mxu1 %v1935_v1 }
  0x3c   :  { %1796 = vmatpush3.bf16.msra.mxu0 %v1936_v2 }
  0x3d   :  { %1818 = vmatpush3.bf16.msra.mxu1 %v1937_v3  ;;  %1797 = vmatprep.subr.bf16.mxu0 %v1938_v4 }
  0x3e   :  { %1819 = vmatprep.subr.bf16.mxu1 %v1939_v5 }
  0x40   :  { %1798 = vmatpush3.bf16.msra.mxu0 %v1940_v6 }
  0x41   :  { %1820 = vmatpush3.bf16.msra.mxu1 %v1941_v7 }
  0x43   :  { %738 = vmatmul.mubr.bf16.vlgmr.msra.gmra.mrb[4].mxu0 %v1608_v10 }
  0x44   :  { %22 = vsyncpa [#allocation5], 0  ;;  %779 = vmatmul.mubr.bf16.vlgmr.msra.gmra.mrb[4].mxu1 %v1610_v14  ;;  %v1942_v16 = vld [vmem:[%s2570_s5] sm:$0xff]   ;;  %v2062_v17 = vmov 0.0   ;;  %v1943_v18 = vld [vmem:[%s2570_s5 + $0x8] sm:$0xff]   ;;  %vm2063_vm0 = vmmov 0  }
  0x45   :  { %1837 = vmatprep.subr.bf16.mxu0 %v2062_v17  ;;  %1845 = vmatprep.subr.bf16.mxu1 %v2062_v17  ;;  %v62_v19 = vld [vmem:[%s2567_s2] sm:$0xff]  ;;  %s2064_s16 = smov 8   ;;  %v63_v20 = vld [vmem:[%s2567_s2 + $0x8] sm:$0xff]  ;;  %vm813_vm1 = vcmask 261120   ;;  %vm892_vm2 = vcmask 1043456   ;;  %vm888_vm3 = vcmask 64512  }
  0x46   :  { %1838 = vmatpush3.bf16.msra.mxu0 %v1942_v16  ;;  %1841 = vmatprep.mubr.msk.bf16.mxu0 %vm2063_vm0, %v2062_v17  ;;  %v1603_v23 = vld [vmem:[%s2569_s4] ss:$0 sm:$0xff]  ;;  %v2422_v9 = vld [vmem:[%s2566_s1 + $0x8] sm:$0xff]  ;;  %s2069_s21 = smov 16   ;;  %vm1555_vm4 = vcmask 130048   ;;  %vm1558_vm5 = vcmask 146432  }
  0x47   :  { %1839 = vmatprep.subr.bf16.mxu0 %v2062_v17  ;;  %1847 = vmatprep.mubr.msk.bf16.mxu1 %vm2063_vm0, %v2062_v17  ;;  %v1676_v57 = vld [vmem:[%s2571_s6] ss:$0 sm:$0xff]  ;;  %s2070_s6 = smov 32   ;;  %vm1561_vm6 = vcmask 195584   ;;  %vm1566_vm7 = vcmask 326656  }
  0x48   :  { %866 = vrot.lane.b32.xlu0 %v62_v19, %s2064_s16  ;;  %v887_v4 = vld [vmem:[%s2573_s8] sm:$0xf] }
  0x49   :  { %v894_v5 = vsel %vm892_vm2, %v887_v4, 0  ;;  %v886_v6 = vld [vmem:[%s2572_s7] sm:$0xf]  ;;  %s2065_s7 = smov 120   ;;  %v1077_v4 = vld [vmem:[%s2577_s12 + $0x70] sm:$0xff] }
  0x4a   :  { %1840 = vmatpush3.bf16.msra.mxu0 %v1943_v18  ;;  %1846 = vmatpush3.bf16.msra.mxu1 %v894_v5  ;;  %v941_v7 = vsel %vm892_vm2, %v886_v6, 0  ;;  %v2417_v8 = vld [vmem:[%s2566_s1] sm:$0xff]  ;;  %s2066_s1 = smov 24   ;;  %v1074_v5 = vld [vmem:[%s2577_s12 + $0x58] sm:$0xff] }
  0x4b   :  { %1851 = vmatprep.subr.bf16.mxu0 %v2062_v17  ;;  %1857 = vmatprep.subr.bf16.mxu1 %v2062_v17  ;;  %v885_v10 = vpack.c.bf16 %v2422_v9, %v2417_v8  ;;  %v1078_v6 = vld [vmem:[%s2577_s12 + $0x78] sm:$0xff] }
  0x4c   :  { %868 = vrot.lane.b32.xlu0 %v63_v20, %s2064_s16 }
  0x4d   :  { %1848 = vmatmul.mubr.msk.bf16.vlgmr.msra.gmra.mrb[8].mxu1 %vm888_vm3, %v885_v10  ;;  %v1702_v10 = vcombine.high %v1074_v5, %v1078_v6 }
  0x4e   :  { %1861 = vmatprep.mubr.msk.bf16.mxu1 %vm2063_vm0, %v2062_v17 }
  0xba   :  { %v867_v11 = vpop.permute.xlu0 %866 }
  0xbe   :  { %v869_v15 = vpop.permute.xlu0 %868 }
  0xf6   :  { %v1755_v21 = vpop.f32.mrb[0].mxu0 }
  0xf7   :  { %v1777_v22 = vpop.f32.mrb[0].mxu1  ;;  %v1756_v24 = vpop.f32.mrb[1].mxu0 }
  0xf8   :  { %v1757_v25 = vadd.f32 %v1756_v24, %v1755_v21  ;;  %v1778_v26 = vpop.f32.mrb[1].mxu1  ;;  %v1758_v27 = vpop.f32.mrb[2].mxu0 }
  0xf9   :  { %v1779_v28 = vadd.f32 %v1778_v26, %v1777_v22  ;;  %v1780_v29 = vpop.f32.mrb[2].mxu1  ;;  %v1759_v30 = vpop.f32.mrb[3].mxu0 }
  0xfa   :  { %v658_v31 = vadd.f32 %v1757_v25, %v1603_v23  ;;  %v1760_v32 = vadd.f32 %v1759_v30, %v1758_v27  ;;  %v1781_v33 = vpop.f32.mrb[3].mxu1  ;;  %v1944_v27 = vld [vmem:[%s2575_s10] sm:$0xff]  }
  0xfb   :  { %v1782_v34 = vadd.f32 %v1781_v33, %v1780_v29  ;;  %1858 = vmatpush3.bf16.msra.mxu1 %v1944_v27  ;;  %v1063_v29 = vld [vmem:[%s2577_s12] sm:$0xff] }
  0xfc   :  { %v699_v35 = vadd.f32 %v1779_v28, %v658_v31  ;;  %v661_v36 = vadd.f32 %v1760_v32, %v1603_v23  ;;  %1859 = vmatprep.subr.bf16.mxu1 %v2062_v17  ;;  %v1945_v28 = vld [vmem:[%s2575_s10 + $0x8] sm:$0xff]   ;;  %v1067_v30 = vld [vmem:[%s2577_s12 + $0x20] sm:$0xff] }
  0xfd   :  { %v1064_v31 = vld [vmem:[%s2577_s12 + $0x8] sm:$0xff]  ;;  %v1687_v32 = vcombine.low %v1063_v29, %v1067_v30  ;;  %v1688_v33 = vcombine.high %v1063_v29, %v1067_v30 }
  0xfe   :  { %v702_v37 = vadd.f32 %v1782_v34, %v661_v36  ;;  %v1071_v34 = vld [vmem:[%s2577_s12 + $0x40] sm:$0xff] }
  0xff   :  { %1860 = vmatpush3.bf16.msra.mxu1 %v1945_v28 }
 0x116   :  { %v1799_v38 = vpop.f32.mrb[4].mxu0 }
 0x117   :  { %v1821_v39 = vpop.f32.mrb[4].mxu1  ;;  %v1800_v40 = vpop.f32.mrb[5].mxu0 }
 0x118   :  { %v1801_v41 = vadd.f32 %v1800_v40, %v1799_v38  ;;  %v1822_v42 = vpop.f32.mrb[5].mxu1  ;;  %v1802_v43 = vpop.f32.mrb[6].mxu0  ;;  %v1065_v40 = vld [vmem:[%s2577_s12 + $0x10] sm:$0xff] }
 0x119   :  { %v1823_v44 = vadd.f32 %v1822_v42, %v1821_v39  ;;  %v1824_v45 = vpop.f32.mrb[6].mxu1  ;;  %v1803_v46 = vpop.f32.mrb[7].mxu0  ;;  %v2067_v39 = vmov 0  }
 0x11a   :  { %v740_v47 = vadd.f32 %v1801_v41, %v699_v35  ;;  %v1804_v48 = vadd.f32 %v1803_v46, %v1802_v43  ;;  %v1825_v49 = vpop.f32.mrb[7].mxu1  ;;  %v1075_v35 = vld [vmem:[%s2577_s12 + $0x60] sm:$0xff]  ;;  %v1069_v41 = vld [vmem:[%s2577_s12 + $0x30] sm:$0xff]  ;;  %v1070_v46 = vld [vmem:[%s2577_s12 + $0x38] sm:$0xff] }
 0x11b   :  { %v1826_v50 = vadd.f32 %v1825_v49, %v1824_v45  ;;  %v1696_v38 = vcombine.high %v1071_v34, %v1075_v35  ;;  %v1695_v42 = vcombine.low %v1071_v34, %v1075_v35  ;;  %v1691_v43 = vcombine.low %v1065_v40, %v1069_v41  ;;  %v1066_v45 = vld [vmem:[%s2577_s12 + $0x18] sm:$0xff]  ;;  %v1682_v49 = vld [vmem:[%s2574_s9] ss:$0 sm:$0xff]  ;;  %s2068_s9 = smov 96  }
 0x11c   :  { %v781_v51 = vadd.f32 %v1823_v44, %v740_v47  ;;  %v743_v52 = vadd.f32 %v1804_v48, %v702_v37  ;;  %v1692_v44 = vcombine.high %v1065_v40, %v1069_v41  ;;  %v1693_v47 = vcombine.low %v1066_v45, %v1070_v46 }
 0x11e   :  { %v784_v53 = vadd.f32 %v1826_v50, %v743_v52  ;;  %v787_v54 = vmax.f32 %v781_v51, 0.0 }
 0x120   :  { %v788_v55 = vmax.f32 %v784_v53, 0.0  ;;  %v930_v23 = vpop.f32.mrb[8].mxu1 }
 0x121   :  { %v1849_v24 = vpop.f32.mrb[9].mxu1 }
 0x122   :  { %v789_v56 = vpack.c.bf16 %v788_v55, %v787_v54  ;;  %v933_v25 = vpop.f32.mrb[10].mxu1 }
 0x123   :  { %v1850_v26 = vpop.f32.mrb[11].mxu1 }
 0x124   :  { %1842 = vmatmul.mubr.msk.bf16.vlgmr.msra.gmra.mrb[8].mxu0 %vm813_vm1, %v789_v56  ;;  %v1079_v26 = vld [vmem:[%s2578_s13] sm:$0xff]  ;;  %s2071_s13 = smov [#allocation4]  }
 0x125   :  { %1853 = vmatprep.mubr.msk.bf16.mxu0 %vm2063_vm0, %v2062_v17  ;;  %1852 = vmatpush3.bf16.msra.mxu0 %v941_v7  ;;  %v1068_v17 = vld [vmem:[%s2577_s12 + $0x28] sm:$0xff]  ;;  %s1588_s23 = sshll.u32 %s2071_s13, 4  ;;  %s2528_s23 = int_to_ptr.vmem [resolvable:$true] %s1588_s23 }
 0x126   :  { %v1689_v36 = vcombine.low %v1064_v31, %v1068_v17  ;;  %v1690_v37 = vcombine.high %v1064_v31, %v1068_v17  ;;  %1207 = vmatprep.subr.bf16.mxu0 %v1688_v33  ;;  %s2014_s24 = scalar_lea.vmem %s2528_s23, 256  ;;  %p2019_p1 = scmp.lt.s32.totalorder %s2528_s23, %s2528_s23 }
 0x127   :  { %p2015_p0 = scmp.ne.s32.totalorder %s2528_s23, %s2014_s24  ;;  %p2020_p2 = scmp.lt.s32.totalorder %s2014_s24, %s2014_s24 }
 0x128   :  { %1250 = vmatprep.subr.bf16.mxu1 %v1690_v37 }
 0x129   :  { %p2021_p3 = por %p2020_p2, %p2019_p1 }
 0x12b   :  { %p2022_p4 = pnand %p2021_p3, %p2015_p0 }
 0x1f7   :  { %v851_v58 = vpop.f32.mrb[8].mxu0 }
 0x1f8   :  { %v2402_v59 = vadd.f32 %v1676_v57, %v851_v58  ;;  %v1843_v60 = vpop.f32.mrb[9].mxu0  ;;  %v1076_v58 = vld [vmem:[%s2577_s12 + $0x68] sm:$0xff] }
 0x1f9   :  { %v854_v61 = vpop.f32.mrb[10].mxu0 }
 0x1fa   :  { %v858_v62 = vmul.f32 0.5, %v2402_v59  ;;  %v2405_v63 = vadd.f32 %v1676_v57, %v854_v61  ;;  %v1844_v0 = vpop.f32.mrb[11].mxu0  ;;  %v1072_v57 = vld [vmem:[%s2577_s12 + $0x48] sm:$0xff] }
 0x1fb   :  { %v1698_v0 = vcombine.high %v1072_v57, %v1076_v58 }
 0x1fc   :  { %v860_v1 = vmul.f32 1.442695, %v858_v62  ;;  %v859_v2 = vmul.f32 0.5, %v2405_v63 }
 0x1fe   :  { %1946 = vpow2.f32 %v860_v1  ;;  %v862_v3 = vmul.f32 1.442695, %v859_v2  ;;  %v1697_v1 = vcombine.low %v1072_v57, %v1076_v58  ;;  %v1694_v2 = vcombine.high %v1066_v45, %v1070_v46 }
 0x200   :  { %1948 = vpow2.f32 %v862_v3  ;;  %v1073_v3 = vld [vmem:[%s2577_s12 + $0x50] sm:$0xff] }
 0x201   :  { %v1700_v7 = vcombine.high %v1073_v3, %v1077_v4 }
 0x208   :  { %v1947_v12 = vpop.eup %1946 }
 0x209   :  { %v872_v13 = vmul.f32 %v1947_v12, %v867_v11  ;;  %v1699_v12 = vcombine.low %v1073_v3, %v1077_v4 }
 0x20a   :  { %v1949_v14 = vpop.eup %1948 }
 0x20b   :  { %876 = vrot.lane.b32.xlu1 %v872_v13, %s2065_s7  ;;  %v873_v16 = vmul.f32 %v1949_v14, %v869_v15  ;;  %v1701_v13 = vcombine.low %v1074_v5, %v1078_v6  ;;  %v1683_v14 = vld [vmem:[%s2576_s11] ss:$0 sm:$0xff] }
 0x20f   :  { %878 = vrot.lane.b32.xlu1 %v873_v16, %s2065_s7 }
 0x27d   :  { %v877_v18 = vpop.permute.xlu1 %876 }
 0x27e   :  { %v882_v19 = vadd.f32 %v877_v18, %v2402_v59 }
 0x280   :  { %1541 = vrot.lane.b32.xlu1 %v882_v19, %s2066_s1 }
 0x281   :  { %v879_v20 = vpop.permute.xlu1 %878 }
 0x282   :  { %v883_v21 = vadd.f32 %v879_v20, %v2405_v63 }
 0x284   :  { %v884_v22 = vpack.c.bf16 %v883_v21, %v882_v19 }
 0x286   :  { %1854 = vmatmul.mubr.msk.bf16.vlgmr.msra.gmra.mrb[12].mxu0 %vm888_vm3, %v884_v22  ;;  %v1081_v22 = vlaneseq }
 0x287   :  { %1239 = vmatprep.mubr.bf16.mxu0 %v2067_v39  ;;  %1208 = vmatpush1.bf16.msra.mxu0 %v1687_v32 }
 0x288   :  { %1209 = vmatprep.subr.bf16.mxu0 %v1696_v38 }
 0x28b   :  { %1210 = vmatpush1.bf16.msra.mxu0 %v1695_v42 }
 0x28c   :  { %1293 = vmatprep.subr.bf16.mxu0 %v1692_v44 }
 0x2f2   :  { %v1542_v32 = vpop.permute.xlu1 %1541 }
 0x359   :  { %v977_v48 = vpop.f32.mrb[12].mxu0 }
 0x35a   :  { %v978_v50 = vadd.f32 %v977_v48, %v930_v23  ;;  %v1855_v51 = vpop.f32.mrb[13].mxu0  ;;  %v1082_v23 = vshrl.u32 %v1081_v22, 7 }
 0x35b   :  { %v980_v52 = vpop.f32.mrb[14].mxu0 }
 0x35c   :  { %v991_v53 = vadd.f32 %v1682_v49, %v978_v50  ;;  %v981_v54 = vadd.f32 %v980_v52, %v933_v25  ;;  %v1856_v55 = vpop.f32.mrb[15].mxu0  ;;  %v1083_v24 = vsub.s32 0, %v1082_v23  ;;  %v1091_v25 = vsub.s32 2, %v1082_v23 }
 0x35d   :  { %v1087_v27 = vsub.s32 1, %v1082_v23  ;;  %v1095_v28 = vsub.s32 3, %v1082_v23  ;;  %v1099_v31 = vsub.s32 4, %v1082_v23  ;;  %v1103_v34 = vsub.s32 5, %v1082_v23 }
 0x35e   :  { %v992_v56 = vadd.f32 %v1682_v49, %v981_v54  ;;  %v993_v60 = vmax.f32 %v991_v53, 0.0  ;;  %v1084_v29 = vrot.slane %v1079_v26, %v1083_v24  ;;  %v1092_v30 = vrot.slane %v1079_v26, %v1091_v25 }
 0x35f   :  { %v1088_v33 = vrot.slane %v1079_v26, %v1087_v27  ;;  %v1096_v17 = vrot.slane %v1079_v26, %v1095_v28  ;;  %v1111_v37 = vsub.s32 7, %v1082_v23  ;;  %v1100_v42 = vrot.slane %v1079_v26, %v1099_v31 }
 0x360   :  { %v994_v61 = vmax.f32 %v992_v56, 0.0  ;;  %v2510_v48 = vrot.slane %v1079_v26, %v1103_v34 }
 0x362   :  { %v995_v62 = vpack.c.bf16 %v994_v61, %v993_v60 }
 0x364   :  { %1122 = vrot.lane.b32.xlu0 %v995_v62, %s2068_s9  ;;  %1862 = vmatmul.mubr.msk.bf16.vlgmr.msra.gmra.mrb[12].mxu1 %vm813_vm1, %v995_v62 }
 0x365   :  { %1251 = vmatpush1.bf16.msra.mxu1 %v1689_v36  ;;  %1282 = vmatprep.mubr.bf16.mxu1 %v2067_v39 }
 0x366   :  { %1252 = vmatprep.subr.bf16.mxu1 %v1698_v0 }
 0x368   :  { %1543 = vrot.lane.b32.xlu0 %v883_v21, %s2066_s1 }
 0x369   :  { %1253 = vmatpush1.bf16.msra.mxu1 %v1697_v1 }
 0x36a   :  { %1336 = vmatprep.subr.bf16.mxu1 %v1694_v2 }
 0x3d6   :  { %v1123_v11 = vpop.permute.xlu0 %1122 }
 0x3d7   :  { %1703 = vmatmul.mubr.msk.bf16.vlgmr.msra.gmra.mrb[16].mxu0 %vm813_vm1, %v1123_v11  ;;  %1704 = vmatmul.mubr.msk.bf16.vlgmr.msra.gmra.mrb[16].mxu1 %vm813_vm1, %v1123_v11 }
 0x3d8   :  { %1294 = vmatpush1.bf16.msra.mxu0 %v1691_v43  ;;  %1337 = vmatpush1.bf16.msra.mxu1 %v1693_v47 }
 0x3d9   :  { %1295 = vmatprep.subr.bf16.mxu0 %v1700_v7  ;;  %1338 = vmatprep.subr.bf16.mxu1 %v1702_v10  ;;  %v2519_v7 = vrot.slane %v1079_v26, %v1111_v37 }
 0x3da   :  { %1325 = vmatprep.mubr.bf16.mxu0 %v2067_v39  ;;  %1368 = vmatprep.mubr.bf16.mxu1 %v2067_v39  ;;  %v1544_v35 = vpop.permute.xlu0 %1543 }
 0x3dc   :  { %1296 = vmatpush1.bf16.msra.mxu0 %v1699_v12  ;;  %1339 = vmatpush1.bf16.msra.mxu1 %v1701_v13 }
 0x3df   :  { %1705 = vmatmul.mubr.msk.bf16.vlgmr.msra.gmra.mrb[20].mxu0 %vm813_vm1, %v1123_v11  ;;  %1706 = vmatmul.mubr.msk.bf16.vlgmr.msra.gmra.mrb[20].mxu1 %vm813_vm1, %v1123_v11 }
 0x437   :  { %v1056_v15 = vpop.f32.mrb[12].mxu1 }
 0x438   :  { %v1057_v16 = vadd.f32 %v1683_v14, %v1056_v15  ;;  %v1863_v18 = vpop.f32.mrb[13].mxu1 }
 0x439   :  { %v1059_v19 = vpop.f32.mrb[14].mxu1 }
 0x43a   :  { %v1060_v20 = vadd.f32 %v1683_v14, %v1059_v19  ;;  %1533 = vrot.lane.b32.xlu1 %v1057_v16, %s2069_s21  ;;  %v1864_v21 = vpop.f32.mrb[15].mxu1 }
 0x43c   :  { %1535 = vrot.lane.b32.xlu0 %v1060_v20, %s2069_s21 }
 0x43e   :  { %1549 = vrot.lane.b32.xlu1 %v2417_v8, %s2070_s6  ;;  %v1107_v8 = vsub.s32 6, %v1082_v23 }
 0x440   :  { %1551 = vrot.lane.b32.xlu0 %v2422_v9, %s2070_s6  ;;  %v2508_v47 = vrot.slane %v1079_v26, %v1107_v8 }
 0x4aa   :  { %v1241_v9 = vpop.f32.mrb[16].mxu0  ;;  %v1284_v36 = vpop.f32.mrb[16].mxu1 }
 0x4ab   :  { %v1242_v38 = vadd.f32 %v1241_v9, %v1084_v29  ;;  %v1285_v39 = vadd.f32 %v1284_v36, %v1092_v30  ;;  %v1243_v40 = vpop.f32.mrb[17].mxu0  ;;  %v1286_v41 = vpop.f32.mrb[17].mxu1 }
 0x4ac   :  { %v1244_v43 = vadd.f32 %v1243_v40, %v1088_v33  ;;  %v1287_v44 = vadd.f32 %v1286_v41, %v1096_v17  ;;  %v1534_v45 = vpop.permute.xlu1 %1533  ;;  %v1245_v46 = vpop.f32.mrb[18].mxu0 }
 0x4ad   :  { %v1707_v49 = vmul.f32 -1.442695, %v1242_v38  ;;  %v1709_v50 = vmul.f32 -1.442695, %v1285_v39  ;;  %v1556_v51 = vsel %vm1555_vm4, %v2402_v59, %v1534_v45  ;;  %v1246_v52 = vadd.f32 %v1245_v46, %v1084_v29  ;;  %v1288_v53 = vpop.f32.mrb[18].mxu1  ;;  %v1247_v54 = vpop.f32.mrb[19].mxu0 }
 0x4ae   :  { %v1708_v55 = vmul.f32 -1.442695, %v1244_v43  ;;  %v1710_v56 = vmul.f32 -1.442695, %v1287_v44  ;;  %v1559_v57 = vsel %vm1558_vm5, %v1556_v51, 0.0  ;;  %v1289_v58 = vadd.f32 %v1288_v53, %v1092_v30  ;;  %v1290_v60 = vpop.f32.mrb[19].mxu1  ;;  %v1536_v61 = vpop.permute.xlu0 %1535 }
 0x4af   :  { %1950 = vpow2.f32 %v1707_v49  ;;  %v1715_v62 = vmul.f32 -1.442695, %v1246_v52  ;;  %v1248_v0 = vadd.f32 %v1247_v54, %v1088_v33  ;;  %v1291_v1 = vadd.f32 %v1290_v60, %v1096_v17 }
 0x4b0   :  { %1952 = vpow2.f32 %v1709_v50  ;;  %v1717_v2 = vmul.f32 -1.442695, %v1289_v58  ;;  %v1557_v3 = vsel %vm1555_vm4, %v2405_v63, %v1536_v61  ;;  %v1562_v59 = vsel %vm1561_vm6, %v1559_v57, %v1542_v32  ;;  %v1550_v4 = vpop.permute.xlu1 %1549 }
 0x4b1   :  { %1954 = vpow2.f32 %v1708_v55  ;;  %v1716_v5 = vmul.f32 -1.442695, %v1248_v0  ;;  %v1560_v6 = vsel %vm1558_vm5, %v1557_v3, 0.0  ;;  %v1718_v10 = vmul.f32 -1.442695, %v1291_v1 }
 0x4b2   :  { %1956 = vpow2.f32 %v1710_v56  ;;  %v1564_v11 = vsel %vm813_vm1, %v1562_v59, %v1550_v4  ;;  %v1563_v12 = vsel %vm1561_vm6, %v1560_v6, %v1544_v35  ;;  %v1552_v13 = vpop.permute.xlu0 %1551  ;;  %v1327_v14 = vpop.f32.mrb[20].mxu0 }
 0x4b3   :  { %1958 = vpow2.f32 %v1715_v62  ;;  %v1567_v63 = vsel %vm1566_vm7, %v1564_v11, 0.0  ;;  %v1565_v15 = vsel %vm813_vm1, %v1563_v12, %v1552_v13  ;;  %v1328_v16 = vadd.f32 %v1327_v14, %v1100_v42  ;;  %v1370_v18 = vpop.f32.mrb[20].mxu1  ;;  %v1329_v19 = vpop.f32.mrb[21].mxu0 }
 0x4b4   :  { %1960 = vpow2.f32 %v1717_v2  ;;  %1569 = vst [vmem:[#allocation4] sm:$0xff] %v1567_v63  ;;  %v1568_v20 = vsel %vm1566_vm7, %v1565_v15, 0.0  ;;  %v1371_v21 = vadd.f32 %v1370_v18, %v2508_v47  ;;  %v1330_v22 = vadd.f32 %v1329_v19, %v2510_v48  ;;  %v1372_v23 = vpop.f32.mrb[21].mxu1  ;;  %v1331_v24 = vpop.f32.mrb[22].mxu0 }
 0x4b5   :  { %1962 = vpow2.f32 %v1716_v5  ;;  %1570 = vst [vmem:[#allocation4 + $0x8] sm:$0xff] %v1568_v20  ;;  %v1711_v25 = vmul.f32 -1.442695, %v1328_v16  ;;  %v1373_v26 = vadd.f32 %v1372_v23, %v2519_v7  ;;  %v1332_v27 = vadd.f32 %v1331_v24, %v1100_v42  ;;  %v1374_v28 = vpop.f32.mrb[22].mxu1  ;;  %v1333_v29 = vpop.f32.mrb[23].mxu0 }
 0x4b6   :  { %1964 = vpow2.f32 %v1718_v10  ;;  %v1713_v30 = vmul.f32 -1.442695, %v1371_v21  ;;  %v1712_v31 = vmul.f32 -1.442695, %v1330_v22  ;;  %v1376_v32 = vpop.f32.mrb[23].mxu1 }
 0x4b7   :  { %1966 = vpow2.f32 %v1711_v25  ;;  %v1714_v33 = vmul.f32 -1.442695, %v1373_v26  ;;  %v1719_v17 = vmul.f32 -1.442695, %v1332_v27 }
 0x4b8   :  { %2025 = shalt.err (!%p2022_p4)
}
 0x4b9   :  { %s2026_s7 = scalar_lea.hbm %s2580_s15, 256 }
 0x4ba   :  { %p2027_p5 = scmp.ne.s32.totalorder %s2580_s15, %s2026_s7  ;;  %p2030_p6 = scmp.lt.u32.totalorder %s2026_s7, %s2580_s15 }
 0x4bc   :  { %p2032_p7 = pnand %p2030_p6, %p2027_p5 }
 0x4be   :  { %2035 = shalt.err (!%p2032_p7)
}
 0x4bf   :  { %s2072_s28 = smov 128   ;;  %1968 = vpow2.f32 %v1713_v30  ;;  %v1951_v8 = vpop.eup %1950  ;;  %v1375_v51 = vadd.f32 %v1374_v28, %v2508_v47  ;;  %v1334_v54 = vadd.f32 %v1333_v29, %v2510_v48  ;;  %v1377_v57 = vadd.f32 %v1376_v32, %v2519_v7 }
 0x4c0   :  { %1594 = dma.vmem_to_hbm [thread:$0]  %s2528_s23, 256, %s2580_s15, [#allocation5], %s2072_s28, %s2072_s28, %s2064_s16   ;;  %1970 = vpow2.f32 %v1712_v31  ;;  %v1953_v34 = vpop.eup %1952  ;;  %v1427_v35 = vadd.f32 1.0, %v1951_v8 }
 0x4c1   :  { %1972 = vpow2.f32 %v1714_v33  ;;  %v1955_v9 = vpop.eup %1954  ;;  %v1429_v36 = vadd.f32 1.0, %v1953_v34  ;;  %v1721_v0 = vmul.f32 -1.442695, %v1375_v51  ;;  %v1720_v47 = vmul.f32 -1.442695, %v1334_v54  ;;  %s2073_s15 = smov [#allocation2]  }
 0x4c2   :  { %1974 = vpow2.f32 %v1719_v17  ;;  %v1957_v37 = vpop.eup %1956  ;;  %v1428_v38 = vadd.f32 1.0, %v1955_v9  ;;  %v1722_v3 = vmul.f32 -1.442695, %v1377_v57  ;;  %s1576_s16 = sshll.u32 %s2073_s15, 4  ;;  %s1577_s16 = int_to_ptr.vmem [resolvable:$true] %s1576_s16 }
 0x4c3   :  { %1976 = vrcp.f32 %v1427_v35  ;;  %v1959_v39 = vpop.eup %1958  ;;  %v1430_v40 = vadd.f32 1.0, %v1957_v37  ;;  %s2036_s9 = scalar_lea.vmem %s1577_s16, 1024  ;;  %p2041_p9 = scmp.lt.s32.totalorder %s1577_s16, %s1577_s16 }
 0x4c4   :  { %1978 = vrcp.f32 %v1429_v36  ;;  %v1961_v41 = vpop.eup %1960  ;;  %v1435_v42 = vadd.f32 1.0, %v1959_v39  ;;  %p2037_p8 = scmp.ne.s32.totalorder %s1577_s16, %s2036_s9  ;;  %p2042_p10 = scmp.lt.s32.totalorder %s2036_s9, %s2036_s9 }
 0x4c5   :  { %1980 = vrcp.f32 %v1428_v38  ;;  %v1963_v43 = vpop.eup %1962  ;;  %v1437_v44 = vadd.f32 1.0, %v1961_v41 }
 0x4c6   :  { %1982 = vrcp.f32 %v1430_v40  ;;  %v1965_v45 = vpop.eup %1964  ;;  %v1436_v46 = vadd.f32 1.0, %v1963_v43  ;;  %p2043_p11 = por %p2042_p10, %p2041_p9 }
 0x4c7   :  { %1984 = vrcp.f32 %v1435_v42  ;;  %v1967_v49 = vpop.eup %1966  ;;  %v1438_v50 = vadd.f32 1.0, %v1965_v45 }
 0x4c8   :  { %1986 = vrcp.f32 %v1437_v44  ;;  %v1431_v53 = vadd.f32 1.0, %v1967_v49  ;;  %p2044_p12 = pnand %p2043_p11, %p2037_p8 }
 0x4c9   :  { %v1969_v52 = vpop.eup %1968  ;;  %1988 = vrcp.f32 %v1436_v46 }
 0x4ca   :  { %v1971_v55 = vpop.eup %1970  ;;  %1990 = vrcp.f32 %v1438_v50  ;;  %v1433_v56 = vadd.f32 1.0, %v1969_v52 }
 0x4cb   :  { %v1973_v58 = vpop.eup %1972  ;;  %1992 = vrcp.f32 %v1431_v53  ;;  %v1432_v60 = vadd.f32 1.0, %v1971_v55 }
 0x4cc   :  { %v1975_v61 = vpop.eup %1974  ;;  %1994 = vrcp.f32 %v1433_v56  ;;  %v1434_v62 = vadd.f32 1.0, %v1973_v58 }
 0x4cd   :  { %v1977_v1 = vpop.eup %1976  ;;  %1996 = vrcp.f32 %v1432_v60  ;;  %v1439_v19 = vadd.f32 1.0, %v1975_v61 }
 0x4ce   :  { %v1979_v2 = vpop.eup %1978  ;;  %1998 = vrcp.f32 %v1434_v62 }
 0x4cf   :  { %v1981_v59 = vpop.eup %1980  ;;  %2000 = vpow2.f32 %v1721_v0 }
 0x4d0   :  { %v1983_v48 = vpop.eup %1982  ;;  %v1731_v4 = vpack.c.bf16 %v1981_v59, %v1977_v1  ;;  %2002 = vpow2.f32 %v1720_v47 }
 0x4d1   :  { %v1985_v5 = vpop.eup %1984  ;;  %v1732_v6 = vpack.c.bf16 %v1983_v48, %v1979_v2  ;;  %2004 = vpow2.f32 %v1722_v3 }
 0x4d2   :  { %v1987_v7 = vpop.eup %1986  ;;  %1523 = vst [vmem:[#allocation2] sm:$0xff] %v1731_v4  ;;  %2006 = vrcp.f32 %v1439_v19 }
 0x4d3   :  { %v1989_v10 = vpop.eup %1988  ;;  %1524 = vst [vmem:[#allocation2 + $0x8] sm:$0xff] %v1732_v6 }
 0x4d4   :  { %v1991_v11 = vpop.eup %1990  ;;  %v1735_v12 = vpack.c.bf16 %v1989_v10, %v1985_v5 }
 0x4d5   :  { %v1993_v13 = vpop.eup %1992  ;;  %v1736_v14 = vpack.c.bf16 %v1991_v11, %v1987_v7 }
 0x4d6   :  { %v1995_v63 = vpop.eup %1994  ;;  %1527 = vst [vmem:[#allocation2 + $0x20] sm:$0xff] %v1735_v12 }
 0x4d7   :  { %v1997_v15 = vpop.eup %1996  ;;  %1528 = vst [vmem:[#allocation2 + $0x28] sm:$0xff] %v1736_v14 }
 0x4d8   :  { %v1999_v16 = vpop.eup %1998  ;;  %v1733_v18 = vpack.c.bf16 %v1997_v15, %v1993_v13 }
 0x4d9   :  { %v1734_v20 = vpack.c.bf16 %v1999_v16, %v1995_v63  ;;  %v2001_v21 = vpop.eup %2000 }
 0x4da   :  { %1525 = vst [vmem:[#allocation2 + $0x10] sm:$0xff] %v1733_v18  ;;  %v2003_v22 = vpop.eup %2002  ;;  %v1441_v23 = vadd.f32 1.0, %v2001_v21 }
 0x4db   :  { %1526 = vst [vmem:[#allocation2 + $0x18] sm:$0xff] %v1734_v20  ;;  %v2005_v24 = vpop.eup %2004  ;;  %v1440_v25 = vadd.f32 1.0, %v2003_v22 }
 0x4dc   :  { %2008 = vrcp.f32 %v1441_v23  ;;  %v1442_v26 = vadd.f32 1.0, %v2005_v24  ;;  %v2007_v27 = vpop.eup %2006 }
 0x4dd   :  { %2010 = vrcp.f32 %v1440_v25 }
 0x4de   :  { %2012 = vrcp.f32 %v1442_v26 }
 0x4e6   :  { %v2009_v28 = vpop.eup %2008 }
 0x4e7   :  { %v2011_v29 = vpop.eup %2010 }
 0x4e8   :  { %v2013_v30 = vpop.eup %2012  ;;  %v1737_v31 = vpack.c.bf16 %v2011_v29, %v2007_v27 }
 0x4e9   :  { %v1738_v32 = vpack.c.bf16 %v2013_v30, %v2009_v28 }
 0x4ea   :  { %1529 = vst [vmem:[#allocation2 + $0x30] sm:$0xff] %v1737_v31 }
 0x4eb   :  { %1530 = vst [vmem:[#allocation2 + $0x38] sm:$0xff] %v1738_v32 }
 0x4ec   :  { %2047 = shalt.err (!%p2044_p12)
}
 0x4ed   :  { %s2048_s5 = scalar_lea.hbm %s2579_s14, 1024 }
 0x4ee   :  { %p2049_p13 = scmp.ne.s32.totalorder %s2579_s14, %s2048_s5  ;;  %p2052_p0 = scmp.lt.u32.totalorder %s2048_s5, %s2579_s14 }
 0x4f0   :  { %p2054_p1 = pnand %p2052_p0, %p2049_p13 }
 0x4f2   :  { %2057 = shalt.err (!%p2054_p1)
}
 0x4f3   :  { %s2074_s20 = smov 512  }
 0x4f4   :  { %1582 = dma.vmem_to_hbm [thread:$0]  %s1577_s16, 1024, %s2579_s14, [#allocation3], %s2074_s20, %s2074_s20, %s2070_s6  }
 0x4f5   :  { %2058 = dma.done.wait [#allocation3], 1024  }
 0x4f6   :  { %2059 = vsyncadd [#allocation3], 4294966272 }
 0x4f7   :  { %2060 = dma.done.wait [#allocation5], 256  }
 0x4f8   :  { %2061 = vsyncadd [#allocation5], 4294967040 }
 0x4f9   :  { %1601 = vsyncpa [#allocation3], 1 }
 0x4fa   :  { %1602 = vsyncpa [#allocation5], 1 }

</bundles_post_ra>
